<compile_context>
chip_gen: v6e
topology: v6e:2x2x1
jax: 0.10.0
libtpu: 0.0.40
codegen_flags: <defaults>
</compile_context>

<pallas_src>
import functools
import math

import jax
import jax.numpy as jnp
from jax.experimental import pallas as pl
from jax.experimental.pallas import tpu as pltpu

BN_EPS = 1e-5
ACT_DTYPE = jnp.bfloat16


def _round_up(v, m):
    return (v + m - 1) // m * m


def _pick_row_tile(m, c, target_bytes=2 << 20):
    """Row tile for (M, C) elementwise/reduction kernels (~2 MiB per block)."""
    t = target_bytes // (2 * max(c, 1))
    t = max(8, min(1024, (t // 8) * 8))
    if t >= m:
        t = _round_up(m, 8)
    return t


# ---------------------------------------------------------------------------
# Pallas kernels
# ---------------------------------------------------------------------------
def _matmul_kernel(x_ref, w_ref, o_ref, acc_ref):
    # Canonical output-stationary tiled matmul; K is the innermost grid axis.
    @pl.when(pl.program_id(2) == 0)
    def _():
        acc_ref[...] = jnp.zeros_like(acc_ref)

    acc_ref[...] += jnp.dot(x_ref[...], w_ref[...],
                            preferred_element_type=jnp.float32)

    @pl.when(pl.program_id(2) == pl.num_programs(2) - 1)
    def _():
        o_ref[...] = acc_ref[...].astype(o_ref.dtype)


def _bn_stats_kernel(x_ref, scale_ref, shift_ref, sum_ref, sq_ref, *, m_true):
    # Row-tiled accumulation of per-channel sum / sum-of-squares (f32), bf16
    # input.  Zero-padded rows contribute nothing; divide by the true count.
    @pl.when(pl.program_id(0) == 0)
    def _():
        sum_ref[...] = jnp.zeros_like(sum_ref)
        sq_ref[...] = jnp.zeros_like(sq_ref)

    x = x_ref[...].astype(jnp.float32)
    sum_ref[...] += jnp.sum(x, axis=0, keepdims=True)
    sq_ref[...] += jnp.sum(x * x, axis=0, keepdims=True)

    @pl.when(pl.program_id(0) == pl.num_programs(0) - 1)
    def _():
        inv_m = 1.0 / float(m_true)
        mean = sum_ref[...] * inv_m
        # TODO(synk): single-pass E[x^2]-mean^2 in f32 is cancellative for very
        # large activations; a two-pass scheme costs another full HBM read.
        var = jnp.maximum(sq_ref[...] * inv_m - mean * mean, 0.0)
        inv = jax.lax.rsqrt(var + BN_EPS)
        scale_ref[...] = inv
        shift_ref[...] = -mean * inv


def _aarelu(x, a):
    a = jnp.maximum(a, 1e-6)
    cutoff = a * math.exp(math.pi / 2.0)
    y = jnp.where(x > 0.0, x, 0.0)
    x_safe = jnp.where(x < a, a, x)
    t = jnp.log(x_safe / a)
    # sin() via odd Taylor series; only [0, pi/2] matters (x >= cutoff is
    # overwritten below) so the clip is exact on the used branch.
    t = jnp.clip(t, 0.0, math.pi / 2.0)
    t2 = t * t
    sin_t = t * (1.0 + t2 * (-1.0 / 6.0 + t2 * (1.0 / 120.0 + t2 * (
        -1.0 / 5040.0 + t2 * (1.0 / 362880.0 + t2 * (-1.0 / 39916800.0))))))
    roll = a * sin_t + a
    y = jnp.where(x >= a, roll, y)
    y = jnp.where(x >= cutoff, 2.0 * a, y)
    return y


def _eltwise_kernel(alpha_ref, x_ref, scale_ref, shift_ref, *rest,
                    apply_act, has_residual):
    # y = x * scale + shift [+ residual] ; optionally AAReLU(y).  bf16 I/O,
    # f32 math.
    y = x_ref[...].astype(jnp.float32) * scale_ref[...] + shift_ref[...]
    if has_residual:
        res_ref, o_ref = rest
        y = y + res_ref[...].astype(jnp.float32)
    else:
        (o_ref,) = rest
    if apply_act:
        y = _aarelu(y, alpha_ref[0])
    o_ref[...] = y.astype(o_ref.dtype)


def _dab_kernel(w_ref, alpha_ref, x_ref, scale_ref, shift_ref, o_ref, *,
                apply_act, hdim, wdim):
    # Fused BN-affine + depthwise 3x3 gaussian blur (stride 2) + optional
    # AAReLU.  x_ref is the zero-padded *raw* activation, parity-reshaped to
    # (Hp/2, 2, Wp/2, 2C) so every stride-2 tap is a static unit-stride slice
    # (row parity on dim 1, column parity folded into lanes).  Because the
    # blur kernel sums to 1:  blur(pad0(s*x+b)) = s*blur(pad0(x)) + b*wacc,
    # where wacc is the in-bounds kernel-weight fraction (border correction).
    ho, wo, c = o_ref.shape
    hi2 = jax.lax.broadcasted_iota(jnp.int32, (ho, wo, c), 0) * 2
    wi2 = jax.lax.broadcasted_iota(jnp.int32, (ho, wo, c), 1) * 2
    acc = jnp.zeros((ho, wo, c), jnp.float32)
    wacc = jnp.zeros((ho, wo, c), jnp.float32)
    for ki in range(3):
        for kj in range(3):
            g = w_ref[ki * 3 + kj]
            tap = x_ref[ki // 2:ki // 2 + ho, (ki % 2):(ki % 2) + 1,
                        kj // 2:kj // 2 + wo,
                        (kj % 2) * c:(kj % 2) * c + c][:, 0]
            acc = acc + g * tap.astype(jnp.float32)
            r = hi2 + (ki - 1)
            q = wi2 + (kj - 1)
            valid = (r >= 0) & (r < hdim) & (q >= 0) & (q < wdim)
            wacc = wacc + g * valid.astype(jnp.float32)
    y = acc * scale_ref[0] + shift_ref[0] * wacc
    if apply_act:
        y = _aarelu(y, alpha_ref[0])
    o_ref[...] = y.astype(o_ref.dtype)


def _maxblur_kernel(w_ref, x_ref, o_ref, *, hdim, wdim):
    # Fused dense 3x3 max-pool (stride 1, pad 1) + gaussian blur (stride 2,
    # pad 1).  Input is nonnegative (post-AAReLU), so zero padding is
    # equivalent to -inf padding for the max; the blur's zero pad is handled
    # by masking out-of-range blur taps.  Combined window is 5x5, read once
    # from the parity-reshaped zero-padded (by 2) activation.
    ho, wo, c = o_ref.shape
    hi2 = jax.lax.broadcasted_iota(jnp.int32, (ho, wo, c), 0) * 2
    wi2 = jax.lax.broadcasted_iota(jnp.int32, (ho, wo, c), 1) * 2
    slabs = [[None] * 5 for _ in range(5)]
    for u in range(5):
        for v in range(5):
            slabs[u][v] = x_ref[u // 2:u // 2 + ho, (u % 2):(u % 2) + 1,
                                v // 2:v // 2 + wo,
                                (v % 2) * c:(v % 2) * c + c][:, 0]
    acc = jnp.zeros((ho, wo, c), jnp.float32)
    for ki in range(3):
        for kj in range(3):
            m = slabs[ki][kj]
            for di in range(3):
                for dj in range(3):
                    if di == 0 and dj == 0:
                        continue
                    m = jnp.maximum(m, slabs[ki + di][kj + dj])
            r = hi2 + (ki - 1)
            q = wi2 + (kj - 1)
            valid = (r >= 0) & (r < hdim) & (q >= 0) & (q < wdim)
            acc = acc + (w_ref[ki * 3 + kj] * valid.astype(jnp.float32)
                         ) * m.astype(jnp.float32)
    o_ref[...] = acc.astype(o_ref.dtype)


# ---------------------------------------------------------------------------
# pallas_call wrappers (jitted per shape so each kernel compiles once)
# ---------------------------------------------------------------------------
@jax.jit
def pallas_matmul(x, w):
    """(M, K) @ (K, N) in bf16 -> bf16 (M, N), f32 accumulation."""
    M, K = x.shape
    _, N = w.shape
    tm = min(256, _round_up(M, 16))
    # Late layers have tiny M; enlarge K/N tiles so the grid (and per-step
    # overhead) shrinks.  Weight tiles stay a few MiB -> fits all generations.
    if M <= 256:
        tk_cap, tn_cap = 1024, 1024
    else:
        tk_cap, tn_cap = 512, 512
    tk = min(tk_cap, _round_up(K, 128))
    tn = min(tn_cap, _round_up(N, 128))
    Mp, Kp, Np = _round_up(M, tm), _round_up(K, tk), _round_up(N, tn)
    xp = x if (Mp, Kp) == (M, K) else jnp.pad(x, ((0, Mp - M), (0, Kp - K)))
    wp = w if (Kp, Np) == (K, N) else jnp.pad(w, ((0, Kp - K), (0, Np - N)))
    out = pl.pallas_call(
        _matmul_kernel,
        out_shape=jax.ShapeDtypeStruct((Mp, Np), ACT_DTYPE),
        grid=(Mp // tm, Np // tn, Kp // tk),
        in_specs=[
            pl.BlockSpec((tm, tk), lambda i, j, k: (i, k)),
            pl.BlockSpec((tk, tn), lambda i, j, k: (k, j)),
        ],
        out_specs=pl.BlockSpec((tm, tn), lambda i, j, k: (i, j)),
        scratch_shapes=[pltpu.VMEM((tm, tn), jnp.float32)],
        compiler_params=pltpu.CompilerParams(
            dimension_semantics=("parallel", "parallel", "arbitrary")),
    )(xp, wp)
    if (Mp, Np) != (M, N):
        out = out[:M, :N]
    return out


@jax.jit
def pallas_bn_stats(x2d):
    M, C = x2d.shape
    tm = _pick_row_tile(M, C)
    Mp = _round_up(M, tm)
    xp = x2d if Mp == M else jnp.pad(x2d, ((0, Mp - M), (0, 0)))
    kernel = functools.partial(_bn_stats_kernel, m_true=M)
    return pl.pallas_call(
        kernel,
        out_shape=(jax.ShapeDtypeStruct((1, C), jnp.float32),
                   jax.ShapeDtypeStruct((1, C), jnp.float32)),
        grid=(Mp // tm,),
        in_specs=[pl.BlockSpec((tm, C), lambda i: (i, 0))],
        out_specs=(pl.BlockSpec((1, C), lambda i: (0, 0)),
                   pl.BlockSpec((1, C), lambda i: (0, 0))),
        scratch_shapes=[pltpu.VMEM((1, C), jnp.float32),
                        pltpu.VMEM((1, C), jnp.float32)],
        compiler_params=pltpu.CompilerParams(
            dimension_semantics=("arbitrary",)),
    )(xp)


@functools.partial(jax.jit, static_argnames=("apply_act", "has_residual"))
def pallas_eltwise(x2d, scale, shift, residual, alpha, *, apply_act,
                   has_residual):
    M, C = x2d.shape
    tm = _pick_row_tile(M, C)
    Mp = _round_up(M, tm)
    pad = Mp - M
    xp = jnp.pad(x2d, ((0, pad), (0, 0))) if pad else x2d
    args = [alpha, xp, scale, shift]
    in_specs = [
        pl.BlockSpec(memory_space=pltpu.MemorySpace.SMEM),   # alpha (1,)
        pl.BlockSpec((tm, C), lambda i: (i, 0)),
        pl.BlockSpec((1, C), lambda i: (0, 0)),
        pl.BlockSpec((1, C), lambda i: (0, 0)),
    ]
    if has_residual:
        rp = jnp.pad(residual, ((0, pad), (0, 0))) if pad else residual
        args.append(rp)
        in_specs.append(pl.BlockSpec((tm, C), lambda i: (i, 0)))
    kernel = functools.partial(_eltwise_kernel, apply_act=apply_act,
                               has_residual=has_residual)
    out = pl.pallas_call(
        kernel,
        out_shape=jax.ShapeDtypeStruct((Mp, C), x2d.dtype),
        grid=(Mp // tm,),
        in_specs=in_specs,
        out_specs=pl.BlockSpec((tm, C), lambda i: (i, 0)),
        compiler_params=pltpu.CompilerParams(
            dimension_semantics=("parallel",)),
    )(*args)
    return out[:M] if pad else out


def _gauss9(sigma):
    s = jnp.maximum(sigma.astype(jnp.float32), 1e-6)
    coords = jnp.array([-1.0, 0.0, 1.0], jnp.float32)
    g = jnp.exp(-(coords[None, :] ** 2 + coords[:, None] ** 2) / (2.0 * s * s))
    return (g / jnp.sum(g)).reshape(9)


@functools.partial(jax.jit, static_argnames=("apply_act",))
def pallas_dab(x, sigma, scale, shift, alpha, *, apply_act):
    """Fused BN-affine + DABPool (3x3 gaussian, stride 2, pad 1) + AAReLU."""
    N, H, W, C = x.shape
    Ho = (H - 1) // 2 + 1
    Wo = (W - 1) // 2 + 1
    Hp = 2 * (Ho + 1)
    Wp = 2 * (Wo + 1)
    w9 = _gauss9(sigma)
    a = jnp.reshape(alpha, (1,)).astype(jnp.float32)
    xp = jnp.pad(x, ((0, 0), (1, Hp - 1 - H), (1, Wp - 1 - W), (0, 0)))
    # Free row-major reshape: row parity on its own axis, column parity folded
    # into lanes -> every stride-2 blur tap is a static unit-stride slice.
    xr = xp.reshape(N, Ho + 1, 2, Wo + 1, 2 * C)
    kernel = functools.partial(_dab_kernel, apply_act=apply_act,
                               hdim=H, wdim=W)
    return pl.pallas_call(
        kernel,
        out_shape=jax.ShapeDtypeStruct((N, Ho, Wo, C), x.dtype),
        grid=(N,),
        in_specs=[
            pl.BlockSpec(memory_space=pltpu.MemorySpace.SMEM),   # w9 (9,)
            pl.BlockSpec(memory_space=pltpu.MemorySpace.SMEM),   # alpha (1,)
            pl.BlockSpec((None, Ho + 1, 2, Wo + 1, 2 * C),
                         lambda n: (n, 0, 0, 0, 0)),
            pl.BlockSpec((1, C), lambda n: (0, 0)),
            pl.BlockSpec((1, C), lambda n: (0, 0)),
        ],
        out_specs=pl.BlockSpec((None, Ho, Wo, C), lambda n: (n, 0, 0, 0)),
        compiler_params=pltpu.CompilerParams(
            dimension_semantics=("parallel",)),
    )(w9, a, xr, scale, shift)


@jax.jit
def pallas_maxblur(x, sigma):
    """Fused dense 3x3 max-pool (stride 1) + DABPool (stride 2) stem stage."""
    N, H, W, C = x.shape
    Ho = (H - 1) // 2 + 1
    Wo = (W - 1) // 2 + 1
    Hp = 2 * (Ho + 2)
    Wp = 2 * (Wo + 2)
    w9 = _gauss9(sigma)
    xp = jnp.pad(x, ((0, 0), (2, Hp - 2 - H), (2, Wp - 2 - W), (0, 0)))
    xr = xp.reshape(N, Ho + 2, 2, Wo + 2, 2 * C)
    kernel = functools.partial(_maxblur_kernel, hdim=H, wdim=W)
    # TODO(synk): for very large stems on v7x (64 MiB VMEM), tile over output
    # rows instead of whole-image blocks.
    return pl.pallas_call(
        kernel,
        out_shape=jax.ShapeDtypeStruct((N, Ho, Wo, C), x.dtype),
        grid=(N,),
        in_specs=[
            pl.BlockSpec(memory_space=pltpu.MemorySpace.SMEM),   # w9 (9,)
            pl.BlockSpec((None, Ho + 2, 2, Wo + 2, 2 * C),
                         lambda n: (n, 0, 0, 0, 0)),
        ],
        out_specs=pl.BlockSpec((None, Ho, Wo, C), lambda n: (n, 0, 0, 0)),
        compiler_params=pltpu.CompilerParams(
            dimension_semantics=("parallel",)),
    )(w9, xr)


# ---------------------------------------------------------------------------
# Model glue (reshapes / im2col / parameter prep in plain JAX)
# ---------------------------------------------------------------------------
def _im2col(x, k, pad):
    N, H, W, C = x.shape
    xp = jnp.pad(x, ((0, 0), (pad, pad), (pad, pad), (0, 0)))
    cols = [xp[:, i:i + H, j:j + W, :] for i in range(k) for j in range(k)]
    return jnp.concatenate(cols, axis=-1).reshape(N * H * W, k * k * C)


# TODO(synk): 3x3/7x7 convs still use a materialized bf16 im2col; an implicit
# im2col (tap axis folded into the matmul K grid via halo'd manual-DMA LHS
# windows) would remove the k*k activation write/read.
@functools.partial(jax.jit, static_argnums=(2, 3))
def conv2d(x, w2d, k, pad):
    # stride-1 conv as im2col + tiled Pallas matmul (all convs here stride 1).
    N, H, W, C = x.shape
    cols = x.reshape(N * H * W, C) if k == 1 else _im2col(x, k, pad)
    out = pallas_matmul(cols, w2d)
    return out.reshape(N, H, W, w2d.shape[1])


def _fold_lanes(x2d, scale, shift, residual):
    # When C < 128, fold rows into lanes so stores are lane-dense.
    M, C = x2d.shape
    if C >= 128 or 128 % C != 0:
        return x2d, scale, shift, residual, 1
    f = 128 // C
    if M % f:
        return x2d, scale, shift, residual, 1
    x2d = x2d.reshape(M // f, f * C)
    scale = jnp.tile(scale, (1, f))
    shift = jnp.tile(shift, (1, f))
    if residual is not None:
        residual = residual.reshape(M // f, f * C)
    return x2d, scale, shift, residual, f


def batchnorm_act(x, alpha=None, residual=None, apply_act=False):
    # training-mode BN (weight=1, bias=0) + optional residual add + AAReLU.
    N, H, W, C = x.shape
    x2 = x.reshape(-1, C)
    scale, shift = pallas_bn_stats(x2)
    res2 = residual.reshape(-1, C) if residual is not None else None
    a = jnp.reshape(alpha if alpha is not None else jnp.float32(0.0),
                    (1,)).astype(jnp.float32)
    x2f, sc, sh, resf, f = _fold_lanes(x2, scale, shift, res2)
    out = pallas_eltwise(x2f, sc, sh, resf, a, apply_act=apply_act,
                         has_residual=res2 is not None)
    if f != 1:
        out = out.reshape(-1, C)
    return out.reshape(N, H, W, C)


def bottleneck(x, p):
    out = conv2d(x, p["w1"], 1, 0)
    out = batchnorm_act(out, alpha=p["a1"], apply_act=True)          # bn1+act1
    out = conv2d(out, p["w2"], 3, 1)
    if "sigma_main" in p:
        # bn2 + blurpool_main + act2 fused into one DAB kernel
        scale, shift = pallas_bn_stats(out.reshape(-1, out.shape[-1]))
        out = pallas_dab(out, p["sigma_main"], scale, shift, p["a2"],
                         apply_act=True)
    else:
        out = batchnorm_act(out, alpha=p["a2"], apply_act=True)      # bn2+act2
    out = conv2d(out, p["w3"], 1, 0)
    if "wd" in p:                                                    # downsample
        idn = conv2d(x, p["wd"], 1, 0)
        s2, b2 = pallas_bn_stats(idn.reshape(-1, idn.shape[-1]))
        idn = pallas_dab(idn, p["sigma_skip"], s2, b2, jnp.float32(0.0),
                         apply_act=False)                            # bn+blur_skip
    else:
        idn = x
    # bn3 + residual add + act3 fused in one elementwise kernel
    return batchnorm_act(out, alpha=p["a3"], residual=idn, apply_act=True)


def forward(params, x_nchw):
    x = jnp.transpose(x_nchw, (0, 2, 3, 1)).astype(ACT_DTYPE)        # -> NHWC
    out = conv2d(x, params["conv1"], 7, 3)
    out = batchnorm_act(out, alpha=params["a1"], apply_act=True)     # bn1+act1
    out = pallas_maxblur(out, params["sigma1"])   # dense_maxpool + blurpool1
    out = pallas_maxblur(out, params["sigma2"])   # dense_maxpool + blurpool2
    for layer in params["layers"]:
        for p in layer:
            out = bottleneck(out, p)
    # AdaptiveAvgPool2d((1,1)), flatten, tiny FC in plain JAX (padding the
    # (batch, 2048) x (2048, 10) matmul to an MXU tile wastes >90% of it).
    feat = jnp.mean(out.astype(jnp.float32), axis=(1, 2))
    logits = feat @ params["fc_w"] + params["fc_b"][None, :]
    return logits


# ---------------------------------------------------------------------------
# Deterministic parameter init (mirrors module __init__ shapes / init scheme)
# ---------------------------------------------------------------------------
def init_params(key, num_classes=10):
    def nk():
        nonlocal key
        key, sub = jax.random.split(key)
        return sub

    def conv_w(cin, cout, k):
        # kaiming_normal_(mode='fan_out', relu), stored as (k*k*cin, cout)
        # im2col matmul matrix (patch order: (ki, kj) major, channel minor).
        std = math.sqrt(2.0 / (cout * k * k))
        w = std * jax.random.normal(nk(), (k * k * cin, cout), jnp.float32)
        return w.astype(ACT_DTYPE)

    params = {
        "conv1": conv_w(3, 64, 7),
        "a1": jnp.array(6.0, jnp.float32),
        "sigma1": jnp.array(0.5, jnp.float32),
        "sigma2": jnp.array(1.0, jnp.float32),
    }
    inplanes = 64
    layers = []
    for planes, blocks in ((64, 3), (128, 4), (256, 23), (512, 3)):
        sigma = {128: 1.5, 256: 2.0, 512: 2.5}.get(planes, 1.5)
        layer = []
        for b in range(blocks):
            p = {
                "w1": conv_w(inplanes, planes, 1),
                "w2": conv_w(planes, planes, 3),
                "w3": conv_w(planes, planes * 4, 1),
                "a1": jnp.array(6.0, jnp.float32),
                "a2": jnp.array(6.0, jnp.float32),
                "a3": jnp.array(6.0, jnp.float32),
            }
            if b == 0:   # downsample (conv1x1 + bn + blur_skip) and blurpool_main
                p["wd"] = conv_w(inplanes, planes * 4, 1)
                p["sigma_main"] = jnp.array(sigma, jnp.float32)
                p["sigma_skip"] = jnp.array(sigma, jnp.float32)
                inplanes = planes * 4
            layer.append(p)
        layers.append(layer)
    params["layers"] = layers

    fan_in = 512 * 4
    bound = 1.0 / math.sqrt(fan_in)
    params["fc_w"] = jax.random.uniform(nk(), (fan_in, num_classes),
                                        jnp.float32, minval=-bound, maxval=bound)
    params["fc_b"] = jax.random.uniform(nk(), (num_classes,), jnp.float32,
                                        minval=-bound, maxval=bound)
    return params


if __name__ == "__main__":
    root = jax.random.PRNGKey(0)
    pkey, xkey = jax.random.split(root)
    params = init_params(pkey, num_classes=10)
    x = jax.random.normal(xkey, (2, 3, 16, 16), jnp.float32)   # NCHW, like PyTorch
    logits = forward(params, x)
    jax.block_until_ready(logits)
    assert logits.shape == (2, 10)
    print("KERNEL_OK")
</pallas_src>

<mosaic_0001>
module attributes {stable_mosaic.version = 11 : i64} {
  func.func @_matmul_kernel(%arg0: i32, %arg1: i32, %arg2: i32, %arg3: memref<256x256xbf16, #tpu.memory_space<vmem>>, %arg4: memref<256x128xbf16, #tpu.memory_space<vmem>>, %arg5: memref<256x128xbf16, #tpu.memory_space<vmem>>, %arg6: memref<256x128xf32, #tpu.memory_space<vmem>>) attributes {dimension_semantics = [#tpu.dimension_semantics<parallel>, #tpu.dimension_semantics<parallel>, #tpu.dimension_semantics<arbitrary>], iteration_bounds = array<i64: 2, 1, 1>, scalar_prefetch = 0 : i64, scratch_operands = 1 : i64, tpu.core_type = #tpu.core_type<tc>, window_params = [{transform_indices = @transform_0, window_bounds = array<i64: 256, 256>}, {transform_indices = @transform_1, window_bounds = array<i64: 256, 128>}, {transform_indices = @transform_2, window_bounds = array<i64: 256, 128>}]} {
    %c0_i32 = arith.constant 0 : i32
    %0 = arith.cmpi eq, %arg2, %c0_i32 : i32
    %1 = arith.extui %0 : i1 to i32
    %c0_i32_0 = arith.constant 0 : i32
    %2 = arith.cmpi ne, %1, %c0_i32_0 : i32
    scf.if %2 {
      %cst_10 = arith.constant 0.000000e+00 : f32
      %12 = vector.broadcast %cst_10 : f32 to vector<256x128xf32>
      %c0_11 = arith.constant 0 : index
      %c0_12 = arith.constant 0 : index
      %13 = vector.load %arg6[%c0_11, %c0_12] : memref<256x128xf32, #tpu.memory_space<vmem>>, vector<256x128xf32>
      tpu.vector_store %arg6[%c0_11, %c0_12], %12 {strides = array<i32>} : memref<256x128xf32, #tpu.memory_space<vmem>>, vector<256x128xf32>,
    } else {
    }
    %c0 = arith.constant 0 : index
    %c0_1 = arith.constant 0 : index
    %3 = vector.load %arg6[%c0, %c0_1] : memref<256x128xf32, #tpu.memory_space<vmem>>, vector<256x128xf32>
    %c0_2 = arith.constant 0 : index
    %c0_3 = arith.constant 0 : index
    %4 = vector.load %arg3[%c0_2, %c0_3] : memref<256x256xbf16, #tpu.memory_space<vmem>>, vector<256x256xbf16>
    %c0_4 = arith.constant 0 : index
    %c0_5 = arith.constant 0 : index
    %5 = vector.load %arg4[%c0_4, %c0_5] : memref<256x128xbf16, #tpu.memory_space<vmem>>, vector<256x128xbf16>
    %cst = arith.constant dense<0.000000e+00> : vector<256x128xf32>
    %6 = tpu.matmul %4, %5, %cst {dimension_numbers = #tpu.dot_dimension_numbers<[1], [0], [0], [1], [0, 0, 1, 1], [], []>} : vector<256x256xbf16>, vector<256x128xbf16>, vector<256x128xf32> -> vector<256x128xf32>
    %7 = arith.addf %3, %6 : vector<256x128xf32>
    %c0_6 = arith.constant 0 : index
    %c0_7 = arith.constant 0 : index
    %8 = vector.load %arg6[%c0_6, %c0_7] : memref<256x128xf32, #tpu.memory_space<vmem>>, vector<256x128xf32>
    tpu.vector_store %arg6[%c0_6, %c0_7], %7 {strides = array<i32>} : memref<256x128xf32, #tpu.memory_space<vmem>>, vector<256x128xf32>,
    %c0_i32_8 = arith.constant 0 : i32
    %9 = arith.cmpi eq, %arg2, %c0_i32_8 : i32
    %10 = arith.extui %9 : i1 to i32
    %c0_i32_9 = arith.constant 0 : i32
    %11 = arith.cmpi ne, %10, %c0_i32_9 : i32
    scf.if %11 {
      %c0_10 = arith.constant 0 : index
      %c0_11 = arith.constant 0 : index
      %12 = vector.load %arg6[%c0_10, %c0_11] : memref<256x128xf32, #tpu.memory_space<vmem>>, vector<256x128xf32>
      %13 = arith.truncf %12 : vector<256x128xf32> to vector<256x128xbf16>
      %c0_12 = arith.constant 0 : index
      %c0_13 = arith.constant 0 : index
      %14 = vector.load %arg5[%c0_12, %c0_13] : memref<256x128xbf16, #tpu.memory_space<vmem>>, vector<256x128xbf16>
      tpu.vector_store %arg5[%c0_12, %c0_13], %13 {strides = array<i32>} : memref<256x128xbf16, #tpu.memory_space<vmem>>, vector<256x128xbf16>,
    } else {
    }
    return
  }
  func.func @transform_0(%arg0: i32, %arg1: i32, %arg2: i32) -> (i32, i32) {
    %c0_i32 = arith.constant 0 : i32
    return %arg0, %arg2 : i32, i32
  }
  func.func @transform_1(%arg0: i32, %arg1: i32, %arg2: i32) -> (i32, i32) {
    %c0_i32 = arith.constant 0 : i32
    return %arg2, %arg1 : i32, i32
  }
  func.func @transform_2(%arg0: i32, %arg1: i32, %arg2: i32) -> (i32, i32) {
    %c0_i32 = arith.constant 0 : i32
    return %arg0, %arg1 : i32, i32
  }
}

</mosaic_0001>

<bundles_post_ra>
// kernel: pallas_matmul.1
= control target key start
LH: loop header
LB: loop body
LE: loop exit
PB: predicated region body
PF: predicated region fallthrough
CT: control target
= control target key end

     0   :  { %s1613_s9 = smov 0   ;;  %s1615_s10 = smov 0   ;;  %s1750_s0 = inlined_call_operand.vmem [shape: bf16[512,256], index: 0, kind: input, shape index: {}]   ;;  %s1751_s1 = inlined_call_operand.vmem [shape: bf16[256,128], index: 1, kind: input, shape index: {}]   ;;  %s1752_s2 = inlined_call_operand.vmem [shape: bf16[512,128], index: 2, kind: output, shape index: {}]  }
   0x1   :  { %s1617_s11 = smov 0  }
   0x2 LB: > { %s31_s12 = sadd.s32 1, %s1592_s10  ;;  %p1142_p0 = scmp.ge.s32.totalorder %s1596_s11, 1  ;;  %s1596_s11 = sphi %s1617_s11, %s12_s11   ;;  %s1592_s10 = sphi %s1615_s10, %s1754_s10   ;;  %s1588_s9 = sphi %s1613_s9, %s1753_s9  }
   0x3   : > { %p33_p1 = scmp.ge.s32.totalorder %s31_s12, 2  ;;  %p158_p2 = scmp.lt.s32.totalorder %s1596_s11, 3 }
   0x5   : > { %s1756_s12 = smov (%p33_p1, %s31_s12), 0  ;;  %p159_p3 = pnand %p1142_p0, %p158_p2 }
   0x6   : > { %s1143_s15 = sshll.u32 (!%p159_p3), %s1588_s9, 5 }
   0x7   : > { %162 = sbr.rel (%p159_p3) target bundleno = 305 (0x131), region = 28  ;;  %p198_p4 = scmp.lt.s32.totalorder (!%p159_p3), %s1143_s15, 63 }
   0xc   : > { %v1510_v0 = vld [vmem:[%s1751_s1 + $0x78] sm:$0xff]   ;;  %v1512_v2 = vld [vmem:[%s1751_s1 + $0x70] sm:$0xff]   ;;  %v1514_v4 = vld [vmem:[%s1751_s1 + $0x68] sm:$0xff]   ;;  %s1758_s15 = smov (!%p198_p4, %s1143_s15), 63 }
   0xd   : > { %v1511_v1 = vld [vmem:[%s1751_s1 + $0x38] sm:$0xff]   ;;  %1358 = vmatprep.subr.bf16.mxu0 %v1510_v0  ;;  %1470 = vmatprep.subr.bf16.mxu1 %v1510_v0  ;;  %v1513_v3 = vld [vmem:[%s1751_s1 + $0x30] sm:$0xff]   ;;  %v1515_v5 = vld [vmem:[%s1751_s1 + $0x28] sm:$0xff]   ;;  %s1230_s30 = sshll.u32 %s1758_s15, 3  ;;  %s1147_s26 = sshll.u32 %s1758_s15, 2 }
   0xe   : > { %1359 = vmatpush3.bf16.msra.mxu0 %v1511_v1  ;;  %1478 = vmatpush3.bf16.msra.mxu1 %v1511_v1  ;;  %v1516_v6 = vld [vmem:[%s1751_s1 + $0x60] sm:$0xff]   ;;  %v1518_v8 = vld [vmem:[%s1751_s1 + $0x58] sm:$0xff]   ;;  %s1664_s7 = scalar_lea.vmem %s1750_s0, %s1230_s30  ;;  %v1520_v10 = vld [vmem:[%s1751_s1 + $0x50] sm:$0xff]   ;;  %s1723_s29 = scalar_lea.vmem %s1752_s2, %s1147_s26 }
   0xf   : > { %1360 = vmatprep.subr.bf16.mxu0 %v1512_v2  ;;  %1471 = vmatprep.subr.bf16.mxu1 %v1512_v2  ;;  %v1517_v7 = vld [vmem:[%s1751_s1 + $0x20] sm:$0xff]   ;;  %v1519_v9 = vld [vmem:[%s1751_s1 + $0x18] sm:$0xff]   ;;  %v1521_v13 = vld [vmem:[%s1751_s1 + $0x10] sm:$0xff]  }
  0x10   : > { %v1528_v11 = vld [vmem:[%s1664_s7 + $0x4] ss:$8 sps:$4 sm:$0xff]   ;;  %v1526_v18 = vld [vmem:[%s1664_s7] ss:$8 sps:$4 sm:$0xff]   ;;  %v1532_v20 = vld [vmem:[%s1664_s7 + $0x14] ss:$8 sps:$4 sm:$0xff]  }
  0x11   : > { %v1531_v12 = vld [vmem:[%s1664_s7 + $0x84] ss:$8 sps:$4 sm:$0xff]   ;;  %647 = vmatprep.mubr.bf16.mxu0 %v1528_v11  ;;  %v1529_v19 = vld [vmem:[%s1664_s7 + $0x80] ss:$8 sps:$4 sm:$0xff]   ;;  %v1534_v21 = vld [vmem:[%s1664_s7 + $0x94] ss:$8 sps:$4 sm:$0xff]  }
  0x12   : > { %1361 = vmatpush3.bf16.msra.mxu0 %v1513_v3  ;;  %1479 = vmatpush3.bf16.msra.mxu1 %v1513_v3  ;;  %v1522_v14 = vld [vmem:[%s1751_s1 + $0x48] sm:$0xff]   ;;  %v1524_v16 = vld [vmem:[%s1751_s1 + $0x40] sm:$0xff]   ;;  %v1536_v22 = vld [vmem:[%s1664_s7 + $0x10] ss:$8 sps:$4 sm:$0xff]  }
  0x13   : > { %1362 = vmatprep.subr.bf16.mxu0 %v1514_v4  ;;  %1472 = vmatprep.subr.bf16.mxu1 %v1514_v4  ;;  %v1523_v15 = vld [vmem:[%s1751_s1 + $0x8] sm:$0xff]   ;;  %v1525_v17 = vld [vmem:[%s1751_s1] sm:$0xff]   ;;  %v1537_v23 = vld [vmem:[%s1664_s7 + $0x90] ss:$8 sps:$4 sm:$0xff]  }
  0x14   : > { %711 = vmatprep.mubr.bf16.mxu1 %v1531_v12  ;;  %v1538_v24 = vld [vmem:[%s1664_s7 + $0x24] ss:$8 sps:$4 sm:$0xff]   ;;  %v1542_v26 = vld [vmem:[%s1664_s7 + $0x20] ss:$8 sps:$4 sm:$0xff]   ;;  %v1544_v28 = vld [vmem:[%s1664_s7 + $0x34] ss:$8 sps:$4 sm:$0xff]  }
  0x15   : > { %v1540_v25 = vld [vmem:[%s1664_s7 + $0xa4] ss:$8 sps:$4 sm:$0xff]   ;;  %v1543_v27 = vld [vmem:[%s1664_s7 + $0xa0] ss:$8 sps:$4 sm:$0xff]   ;;  %v1546_v29 = vld [vmem:[%s1664_s7 + $0xb4] ss:$8 sps:$4 sm:$0xff]  }
  0x16   : > { %1363 = vmatpush3.bf16.msra.mxu0 %v1515_v5  ;;  %1480 = vmatpush3.bf16.msra.mxu1 %v1515_v5  ;;  %v1548_v30 = vld [vmem:[%s1664_s7 + $0x30] ss:$8 sps:$4 sm:$0xff]   ;;  %v1550_v32 = vld [vmem:[%s1664_s7 + $0x44] ss:$8 sps:$4 sm:$0xff]   ;;  %v1554_v34 = vld [vmem:[%s1664_s7 + $0x40] ss:$8 sps:$4 sm:$0xff]  }
  0x17   : > { %1364 = vmatprep.subr.bf16.mxu0 %v1516_v6  ;;  %1473 = vmatprep.subr.bf16.mxu1 %v1516_v6  ;;  %v1549_v31 = vld [vmem:[%s1664_s7 + $0xb0] ss:$8 sps:$4 sm:$0xff]   ;;  %v1552_v33 = vld [vmem:[%s1664_s7 + $0xc4] ss:$8 sps:$4 sm:$0xff]   ;;  %v1555_v35 = vld [vmem:[%s1664_s7 + $0xc0] ss:$8 sps:$4 sm:$0xff]  }
  0x18   : > { %v1556_v36 = vld [vmem:[%s1664_s7 + $0x54] ss:$8 sps:$4 sm:$0xff]   ;;  %v1560_v38 = vld [vmem:[%s1664_s7 + $0x50] ss:$8 sps:$4 sm:$0xff]   ;;  %v1562_v40 = vld [vmem:[%s1664_s7 + $0x64] ss:$8 sps:$4 sm:$0xff]  }
  0x19   : > { %v1558_v37 = vld [vmem:[%s1664_s7 + $0xd4] ss:$8 sps:$4 sm:$0xff]   ;;  %v1561_v39 = vld [vmem:[%s1664_s7 + $0xd0] ss:$8 sps:$4 sm:$0xff]   ;;  %v1564_v41 = vld [vmem:[%s1664_s7 + $0xe4] ss:$8 sps:$4 sm:$0xff]  }
  0x1a   : > { %1365 = vmatpush3.bf16.msra.mxu0 %v1517_v7  ;;  %1481 = vmatpush3.bf16.msra.mxu1 %v1517_v7  ;;  %v1566_v42 = vld [vmem:[%s1664_s7 + $0x60] ss:$8 sps:$4 sm:$0xff]   ;;  %v1568_v44 = vld [vmem:[%s1664_s7 + $0x74] ss:$8 sps:$4 sm:$0xff]   ;;  %v1572_v46 = vld [vmem:[%s1664_s7 + $0x70] ss:$8 sps:$4 sm:$0xff]  }
  0x1b   : > { %1366 = vmatprep.subr.bf16.mxu0 %v1518_v8  ;;  %1474 = vmatprep.subr.bf16.mxu1 %v1518_v8  ;;  %v1567_v43 = vld [vmem:[%s1664_s7 + $0xe0] ss:$8 sps:$4 sm:$0xff]   ;;  %v1570_v45 = vld [vmem:[%s1664_s7 + $0xf4] ss:$8 sps:$4 sm:$0xff]   ;;  %v1573_v47 = vld [vmem:[%s1664_s7 + $0xf0] ss:$8 sps:$4 sm:$0xff]  }
  0x1e   : > { %1367 = vmatpush3.bf16.msra.mxu0 %v1519_v9  ;;  %1482 = vmatpush3.bf16.msra.mxu1 %v1519_v9 }
  0x1f   : > { %1368 = vmatprep.subr.bf16.mxu0 %v1520_v10  ;;  %1475 = vmatprep.subr.bf16.mxu1 %v1520_v10 }
  0x22   : > { %1369 = vmatpush3.bf16.msra.mxu0 %v1521_v13  ;;  %1483 = vmatpush3.bf16.msra.mxu1 %v1521_v13 }
  0x23   : > { %1370 = vmatprep.subr.bf16.mxu0 %v1522_v14  ;;  %1476 = vmatprep.subr.bf16.mxu1 %v1522_v14 }
  0x26   : > { %1371 = vmatpush3.bf16.msra.mxu0 %v1523_v15  ;;  %1484 = vmatpush3.bf16.msra.mxu1 %v1523_v15 }
  0x27   : > { %1372 = vmatprep.subr.bf16.mxu0 %v1524_v16  ;;  %1477 = vmatprep.subr.bf16.mxu1 %v1524_v16 }
  0x2a   : > { %1373 = vmatpush3.bf16.msra.mxu0 %v1525_v17  ;;  %1485 = vmatpush3.bf16.msra.mxu1 %v1525_v17 }
  0x2d   : > { %648 = vmatmul.mubr.bf16.vlgmr.msra.gmra.mxu0 %v1526_v18  ;;  %712 = vmatmul.mubr.bf16.vlgmr.msra.gmra.mxu1 %v1529_v19 }
  0x2e   : > { %655 = vmatprep.mubr.bf16.mxu0 %v1532_v20  ;;  %719 = vmatprep.mubr.bf16.mxu1 %v1534_v21 }
  0x35   : > { %656 = vmatmul.mubr.bf16.gmra.mxu0 %v1536_v22  ;;  %720 = vmatmul.mubr.bf16.gmra.mxu1 %v1537_v23 }
  0x36   : > { %663 = vmatprep.mubr.bf16.mxu0 %v1538_v24  ;;  %727 = vmatprep.mubr.bf16.mxu1 %v1540_v25 }
  0x3d   : > { %664 = vmatmul.mubr.bf16.gmra.mxu0 %v1542_v26  ;;  %728 = vmatmul.mubr.bf16.gmra.mxu1 %v1543_v27 }
  0x3e   : > { %671 = vmatprep.mubr.bf16.mxu0 %v1544_v28  ;;  %735 = vmatprep.mubr.bf16.mxu1 %v1546_v29 }
  0x45   : > { %672 = vmatmul.mubr.bf16.gmra.mxu0 %v1548_v30  ;;  %736 = vmatmul.mubr.bf16.gmra.mxu1 %v1549_v31 }
  0x46   : > { %679 = vmatprep.mubr.bf16.mxu0 %v1550_v32  ;;  %743 = vmatprep.mubr.bf16.mxu1 %v1552_v33 }
  0x4d   : > { %680 = vmatmul.mubr.bf16.gmra.mxu0 %v1554_v34  ;;  %744 = vmatmul.mubr.bf16.gmra.mxu1 %v1555_v35 }
  0x4e   : > { %687 = vmatprep.mubr.bf16.mxu0 %v1556_v36  ;;  %751 = vmatprep.mubr.bf16.mxu1 %v1558_v37 }
  0x55   : > { %688 = vmatmul.mubr.bf16.gmra.mxu0 %v1560_v38  ;;  %752 = vmatmul.mubr.bf16.gmra.mxu1 %v1561_v39 }
  0x56   : > { %695 = vmatprep.mubr.bf16.mxu0 %v1562_v40  ;;  %759 = vmatprep.mubr.bf16.mxu1 %v1564_v41 }
  0x5d   : > { %696 = vmatmul.mubr.bf16.gmra.mxu0 %v1566_v42  ;;  %760 = vmatmul.mubr.bf16.gmra.mxu1 %v1567_v43 }
  0x5e   : > { %703 = vmatprep.mubr.bf16.mxu0 %v1568_v44  ;;  %767 = vmatprep.mubr.bf16.mxu1 %v1570_v45 }
  0x65   : > { %704 = vmatmul.mubr.bf16.gmra.mxu0 %v1572_v46  ;;  %768 = vmatmul.mubr.bf16.gmra.mxu1 %v1573_v47 }
  0xed   : > { %v1374_v48 = vpop.f32.mrf.mxu0  ;;  %v1422_v49 = vpop.f32.mrf.mxu1 }
  0xef   : > { %v1375_v50 = vpop.f32.mrf.mxu0  ;;  %v1423_v51 = vpop.f32.mrf.mxu1 }
  0xf0   : > { %v1376_v56 = vadd.f32 %v1375_v50, %v1374_v48  ;;  %v1424_v57 = vadd.f32 %v1423_v51, %v1422_v49 }
  0xf1   : > { %v1377_v52 = vpop.f32.mrf.mxu0  ;;  %v1425_v53 = vpop.f32.mrf.mxu1 }
  0xf3   : > { %v1378_v54 = vpop.f32.mrf.mxu0  ;;  %v1426_v55 = vpop.f32.mrf.mxu1 }
  0xf4   : > { %v1379_v58 = vadd.f32 %v1378_v54, %v1377_v52  ;;  %v1427_v59 = vadd.f32 %v1426_v55, %v1425_v53 }
  0xf5   : > { %v1380_v60 = vpop.f32.mrf.mxu0  ;;  %v1428_v61 = vpop.f32.mrf.mxu1 }
  0xf6   : > { %v1266_v62 = vpack.c.bf16 %v1379_v58, %v1376_v56  ;;  %v1306_v63 = vpack.c.bf16 %v1427_v59, %v1424_v57 }
  0xf7   : > { %v1381_v0 = vpop.f32.mrf.mxu0  ;;  %v1429_v1 = vpop.f32.mrf.mxu1 }
  0xf8   : > { %1267 = vst [vmem:[%s1723_s29] sm:$0xff] %v1266_v62   ;;  %1350 = vst [vmem:[%s1723_s29 + $0x40] sm:$0xff] %v1306_v63   ;;  %v1382_v6 = vadd.f32 %v1381_v0, %v1380_v60  ;;  %v1430_v7 = vadd.f32 %v1429_v1, %v1428_v61 }
  0xf9   : > { %v1383_v2 = vpop.f32.mrf.mxu0  ;;  %v1431_v3 = vpop.f32.mrf.mxu1 }
  0xfb   : > { %v1384_v4 = vpop.f32.mrf.mxu0  ;;  %v1432_v5 = vpop.f32.mrf.mxu1 }
  0xfc   : > { %v1385_v8 = vadd.f32 %v1384_v4, %v1383_v2  ;;  %v1433_v9 = vadd.f32 %v1432_v5, %v1431_v3 }
  0xfd   : > { %v1386_v10 = vpop.f32.mrf.mxu0  ;;  %v1434_v11 = vpop.f32.mrf.mxu1 }
  0xfe   : > { %v1271_v12 = vpack.c.bf16 %v1385_v8, %v1382_v6  ;;  %v1311_v13 = vpack.c.bf16 %v1433_v9, %v1430_v7 }
  0xff   : > { %v1387_v14 = vpop.f32.mrf.mxu0  ;;  %v1435_v15 = vpop.f32.mrf.mxu1 }
 0x100   : > { %1343 = vst [vmem:[%s1723_s29 + $0x8] sm:$0xff] %v1271_v12   ;;  %1351 = vst [vmem:[%s1723_s29 + $0x48] sm:$0xff] %v1311_v13   ;;  %v1388_v20 = vadd.f32 %v1387_v14, %v1386_v10  ;;  %v1436_v21 = vadd.f32 %v1435_v15, %v1434_v11 }
 0x101   : > { %v1389_v16 = vpop.f32.mrf.mxu0  ;;  %v1437_v17 = vpop.f32.mrf.mxu1 }
 0x103   : > { %v1390_v18 = vpop.f32.mrf.mxu0  ;;  %v1438_v19 = vpop.f32.mrf.mxu1 }
 0x104   : > { %v1391_v22 = vadd.f32 %v1390_v18, %v1389_v16  ;;  %v1439_v23 = vadd.f32 %v1438_v19, %v1437_v17 }
 0x105   : > { %v1392_v24 = vpop.f32.mrf.mxu0  ;;  %v1440_v25 = vpop.f32.mrf.mxu1 }
 0x106   : > { %v1276_v26 = vpack.c.bf16 %v1391_v22, %v1388_v20  ;;  %v1316_v27 = vpack.c.bf16 %v1439_v23, %v1436_v21 }
 0x107   : > { %v1393_v28 = vpop.f32.mrf.mxu0  ;;  %v1441_v29 = vpop.f32.mrf.mxu1 }
 0x108   : > { %1344 = vst [vmem:[%s1723_s29 + $0x10] sm:$0xff] %v1276_v26   ;;  %1352 = vst [vmem:[%s1723_s29 + $0x50] sm:$0xff] %v1316_v27   ;;  %v1394_v34 = vadd.f32 %v1393_v28, %v1392_v24  ;;  %v1442_v35 = vadd.f32 %v1441_v29, %v1440_v25 }
 0x109   : > { %v1395_v30 = vpop.f32.mrf.mxu0  ;;  %v1443_v31 = vpop.f32.mrf.mxu1 }
 0x10b   : > { %v1396_v32 = vpop.f32.mrf.mxu0  ;;  %v1444_v33 = vpop.f32.mrf.mxu1 }
 0x10c   : > { %v1397_v36 = vadd.f32 %v1396_v32, %v1395_v30  ;;  %v1445_v37 = vadd.f32 %v1444_v33, %v1443_v31 }
 0x10d   : > { %v1398_v38 = vpop.f32.mrf.mxu0  ;;  %v1446_v39 = vpop.f32.mrf.mxu1 }
 0x10e   : > { %v1281_v40 = vpack.c.bf16 %v1397_v36, %v1394_v34  ;;  %v1321_v41 = vpack.c.bf16 %v1445_v37, %v1442_v35 }
 0x10f   : > { %v1399_v42 = vpop.f32.mrf.mxu0  ;;  %v1447_v43 = vpop.f32.mrf.mxu1 }
 0x110   : > { %1345 = vst [vmem:[%s1723_s29 + $0x18] sm:$0xff] %v1281_v40   ;;  %1353 = vst [vmem:[%s1723_s29 + $0x58] sm:$0xff] %v1321_v41   ;;  %v1400_v48 = vadd.f32 %v1399_v42, %v1398_v38  ;;  %v1448_v49 = vadd.f32 %v1447_v43, %v1446_v39 }
 0x111   : > { %v1401_v44 = vpop.f32.mrf.mxu0  ;;  %v1449_v45 = vpop.f32.mrf.mxu1 }
 0x113   : > { %v1402_v46 = vpop.f32.mrf.mxu0  ;;  %v1450_v47 = vpop.f32.mrf.mxu1 }
 0x114   : > { %v1403_v50 = vadd.f32 %v1402_v46, %v1401_v44  ;;  %v1451_v51 = vadd.f32 %v1450_v47, %v1449_v45 }
 0x115   : > { %v1404_v52 = vpop.f32.mrf.mxu0  ;;  %v1452_v53 = vpop.f32.mrf.mxu1 }
 0x116   : > { %v1286_v54 = vpack.c.bf16 %v1403_v50, %v1400_v48  ;;  %v1326_v55 = vpack.c.bf16 %v1451_v51, %v1448_v49 }
 0x117   : > { %v1405_v56 = vpop.f32.mrf.mxu0  ;;  %v1453_v57 = vpop.f32.mrf.mxu1 }
 0x118   : > { %1346 = vst [vmem:[%s1723_s29 + $0x20] sm:$0xff] %v1286_v54   ;;  %1354 = vst [vmem:[%s1723_s29 + $0x60] sm:$0xff] %v1326_v55   ;;  %v1406_v62 = vadd.f32 %v1405_v56, %v1404_v52  ;;  %v1454_v63 = vadd.f32 %v1453_v57, %v1452_v53 }
 0x119   : > { %v1407_v58 = vpop.f32.mrf.mxu0  ;;  %v1455_v59 = vpop.f32.mrf.mxu1 }
 0x11b   : > { %v1408_v60 = vpop.f32.mrf.mxu0  ;;  %v1456_v61 = vpop.f32.mrf.mxu1 }
 0x11c   : > { %v1409_v0 = vadd.f32 %v1408_v60, %v1407_v58  ;;  %v1457_v1 = vadd.f32 %v1456_v61, %v1455_v59 }
 0x11d   : > { %v1410_v2 = vpop.f32.mrf.mxu0  ;;  %v1458_v3 = vpop.f32.mrf.mxu1 }
 0x11e   : > { %v1291_v4 = vpack.c.bf16 %v1409_v0, %v1406_v62  ;;  %v1331_v5 = vpack.c.bf16 %v1457_v1, %v1454_v63 }
 0x11f   : > { %v1411_v6 = vpop.f32.mrf.mxu0  ;;  %v1459_v7 = vpop.f32.mrf.mxu1 }
 0x120   : > { %1347 = vst [vmem:[%s1723_s29 + $0x28] sm:$0xff] %v1291_v4   ;;  %1355 = vst [vmem:[%s1723_s29 + $0x68] sm:$0xff] %v1331_v5   ;;  %v1412_v12 = vadd.f32 %v1411_v6, %v1410_v2  ;;  %v1460_v13 = vadd.f32 %v1459_v7, %v1458_v3 }
 0x121   : > { %v1413_v8 = vpop.f32.mrf.mxu0  ;;  %v1461_v9 = vpop.f32.mrf.mxu1 }
 0x123   : > { %v1414_v10 = vpop.f32.mrf.mxu0  ;;  %v1462_v11 = vpop.f32.mrf.mxu1 }
 0x124   : > { %v1415_v14 = vadd.f32 %v1414_v10, %v1413_v8  ;;  %v1463_v15 = vadd.f32 %v1462_v11, %v1461_v9 }
 0x125   : > { %v1416_v16 = vpop.f32.mrf.mxu0  ;;  %v1464_v17 = vpop.f32.mrf.mxu1 }
 0x126   : > { %v1296_v18 = vpack.c.bf16 %v1415_v14, %v1412_v12  ;;  %v1336_v19 = vpack.c.bf16 %v1463_v15, %v1460_v13 }
 0x127   : > { %v1417_v20 = vpop.f32.mrf.mxu0  ;;  %v1465_v21 = vpop.f32.mrf.mxu1 }
 0x128   : > { %1348 = vst [vmem:[%s1723_s29 + $0x30] sm:$0xff] %v1296_v18   ;;  %1356 = vst [vmem:[%s1723_s29 + $0x70] sm:$0xff] %v1336_v19   ;;  %v1418_v26 = vadd.f32 %v1417_v20, %v1416_v16  ;;  %v1466_v27 = vadd.f32 %v1465_v21, %v1464_v17 }
 0x129   : > { %v1419_v22 = vpop.f32.mrf.mxu0  ;;  %v1467_v23 = vpop.f32.mrf.mxu1 }
 0x12b   : > { %v1420_v24 = vpop.f32.mrf.mxu0  ;;  %v1468_v25 = vpop.f32.mrf.mxu1 }
 0x12c   : > { %v1421_v28 = vadd.f32 %v1420_v24, %v1419_v22  ;;  %v1469_v29 = vadd.f32 %v1468_v25, %v1467_v23 }
 0x12e   : > { %v1301_v30 = vpack.c.bf16 %v1421_v28, %v1418_v26  ;;  %v1341_v31 = vpack.c.bf16 %v1469_v29, %v1466_v27 }
 0x130   : > { %1349 = vst [vmem:[%s1723_s29 + $0x38] sm:$0xff] %v1301_v30   ;;  %1357 = vst [vmem:[%s1723_s29 + $0x78] sm:$0xff] %v1341_v31  }
 0x131 PF: > { %s12_s11 = sadd.s32 1, %s1596_s11   ;;  %s1753_s9 = smov %s1592_s10 }
 0x132   : > { %p9_p5 = scmp.ge.s32.totalorder %s12_s11, 4   ;;  %s1754_s10 = smov %s1756_s12 }
 0x134   :  { %11 = sbr.rel (!%p9_p5) target bundleno = 2 (0x2), region = 69 }

</bundles_post_ra>
